<compile_context>
chip_gen: v5e
topology: v5e:2x2
jax: 0.10.0
libtpu: 0.0.40
codegen_flags: <defaults>
</compile_context>

<pallas_src>
import functools

import jax
import jax.numpy as jnp
from jax.experimental import pallas as pl
from jax.experimental.pallas import tpu as pltpu


def cnn_kernel(p_ref, w_ref, b_ref, o_ref, *, l_out, l_pad):
    # p_ref: (BT*L_pad, CK)  im2col patches for BT batch elements (rows padded
    #                        to L_pad per element; padded rows are all-zero)
    # w_ref: (CK, Np)        conv weight as a matmul operand (lane-padded cols)
    # b_ref: (1, Np)         conv bias (f32, lane-padded)
    # o_ref: (BT, Np)        pooled output rows (lane-dense store)
    bt, n_pad = o_ref.shape

    # One large-M MXU matmul over the whole batch tile; f32 accumulation.
    y = jnp.dot(p_ref[...], w_ref[...], preferred_element_type=jnp.float32)

    # Tile-aligned segmented max over each batch element's conv positions.
    y = y.reshape(bt, l_pad, n_pad)                       # no relayout: l_pad % 8 == 0
    pos = jax.lax.broadcasted_iota(jnp.int32, y.shape, 1)
    y = jnp.where(pos < l_out, y, -jnp.inf)               # mask padded conv rows
    pooled = jnp.max(y, axis=1)                           # (BT, Np) sublane reduce

    # Bias + ReLU AFTER the pool: valid because +bias (per column) and relu
    # are monotone, so max_l relu(y_l + b) == relu(max_l y_l + b).
    o_ref[...] = jnp.maximum(pooled + b_ref[...], 0.0)


def _round_up(x, m):
    return ((x + m - 1) // m) * m


def _choose_tiles(batch, l_pad):
    """Pick batch-tile size BT and padded batch size."""
    rows_target = 1024                       # ~85%+ of HBM roofline per measured tiling data
    bt = max(1, rows_target // l_pad)        # target batch elements per grid step
    if batch <= bt:
        return batch, batch                  # single grid step; block == full dims (legal)
    # Large batch: force >= 2 "parallel" tiles so both v7x TensorCores get work.
    bt = min(bt, -(-batch // 2))
    bt = _round_up(bt, 8)                    # sublane-legal block
    return bt, _round_up(batch, bt)


def cnn_forward(x, weight, bias, kernel_size, *, use_bf16=True):
    """x: (B, e_char, max_word_len); weight: (e_word, e_char, K); bias: (e_word,)
       returns (B, e_word, 1), matching the PyTorch module."""
    B, C, W = x.shape
    e_word = weight.shape[0]
    K = kernel_size
    L_out = W + 2 - K + 1                    # conv output length with padding=1
    L_pad = _round_up(L_out, 8)              # sublane-aligned rows per batch element
    CK = C * K                               # contraction dim, NOT padded to 128
    Np = _round_up(e_word, 128)              # lane-dense output / weight columns

    BT, B_pad = _choose_tiles(B, L_pad)
    num_tiles = B_pad // BT
    TM = BT * L_pad

    compute_dtype = jnp.bfloat16 if use_bf16 else jnp.float32
    x = x.astype(compute_dtype)
    weight = weight.astype(compute_dtype)

    # ---- glue: gather-free im2col (K static shifted slices of the small x) ----
    # TODO(synk): fold the im2col into the kernel (K accumulated matmuls on a
    # (B, W+2, C) input, or allow_input_fusion) so patches never touch HBM.
    x_p = jnp.pad(x, ((0, 0), (0, 0), (1, 1)))
    cols = [x_p[:, :, k:k + L_out] for k in range(K)]          # each (B, C, L_out)
    patches = jnp.stack(cols, axis=-1)                         # (B, C, L_out, K)
    patches = patches.transpose(0, 2, 1, 3).reshape(B, L_out, CK)
    # Pad rows L_out -> L_pad and batch B -> B_pad with zeros; padded conv rows
    # are masked to -inf in-kernel before the segmented max, padded batch rows
    # are sliced off below.
    patches = jnp.pad(patches, ((0, B_pad - B), (0, L_pad - L_out), (0, 0)))
    patches2d = patches.reshape(B_pad * L_pad, CK)

    w_mat = weight.reshape(e_word, CK).T                       # (CK, e_word)
    w_mat = jnp.pad(w_mat, ((0, 0), (0, Np - e_word)))
    b_mat = jnp.pad(bias.astype(jnp.float32).reshape(1, e_word),
                    ((0, 0), (0, Np - e_word)))

    out = pl.pallas_call(
        functools.partial(cnn_kernel, l_out=L_out, l_pad=L_pad),
        out_shape=jax.ShapeDtypeStruct((B_pad, Np), jnp.float32),
        grid_spec=pltpu.PrefetchScalarGridSpec(
            num_scalar_prefetch=0,
            grid=(num_tiles,),
            in_specs=[
                pl.BlockSpec((TM, CK), lambda i: (i, 0)),      # batch-tile of patches
                pl.BlockSpec((CK, Np), lambda i: (0, 0)),      # resident weight
                pl.BlockSpec((1, Np), lambda i: (0, 0)),       # resident bias
            ],
            out_specs=pl.BlockSpec((BT, Np), lambda i: (i, 0)),
        ),
        compiler_params=pltpu.CompilerParams(
            dimension_semantics=("parallel",),
        ),
    )(patches2d, w_mat, b_mat)

    # Strip padding; match the PyTorch output shape (B, e_word, 1).
    return out[:B, :e_word].reshape(B, e_word, 1)


def cnn_reference(x, weight, bias, kernel_size):
    """Pure JAX reference mirroring the PyTorch module."""
    B, C, W = x.shape
    K = kernel_size
    L_out = W + 2 - K + 1
    x_pad = jnp.pad(x, ((0, 0), (0, 0), (1, 1)))
    slices = [x_pad[:, :, k:k + L_out] for k in range(K)]
    patches = jnp.stack(slices, axis=-1)                       # (B, C, L_out, K)
    conv = jnp.einsum("bclk,ock->bol", patches, weight) + bias[None, :, None]
    relu = jnp.maximum(conv, 0.0)
    return jnp.max(relu, axis=-1, keepdims=True)               # pool window = L_out


if __name__ == "__main__":
    # Small shapes consistent with the module:
    #   e_char=8, e_word=16, kernel_size=5, max_word_len=12, batch=4
    e_char, e_word, kernel_size, max_word_len, batch = 8, 16, 5, 12, 4

    key = jax.random.PRNGKey(0)
    kx, kw, kb = jax.random.split(key, 3)
    x = jax.random.normal(kx, (batch, e_char, max_word_len), dtype=jnp.float32)
    weight = jax.random.normal(kw, (e_word, e_char, kernel_size),
                               dtype=jnp.float32) * 0.1
    bias = jax.random.normal(kb, (e_word,), dtype=jnp.float32) * 0.1

    ref = cnn_reference(x, weight, bias, kernel_size)

    # Exact f32 path, tight tolerance.
    out_f32 = jax.block_until_ready(
        cnn_forward(x, weight, bias, kernel_size, use_bf16=False))
    assert out_f32.shape == (batch, e_word, 1), out_f32.shape
    assert jnp.allclose(out_f32, ref, atol=1e-5, rtol=1e-5), "f32 mismatch"

    # Default bf16-compute path (all generations), f32 accumulate/epilogue.
    out_bf16 = jax.block_until_ready(
        cnn_forward(x, weight, bias, kernel_size))
    assert out_bf16.shape == (batch, e_word, 1), out_bf16.shape
    assert jnp.allclose(out_bf16, ref, atol=3e-2, rtol=3e-2), "bf16 mismatch"

    print("KERNEL_OK")
</pallas_src>

<mosaic_0001>
module attributes {stable_mosaic.version = 11 : i64} {
  func.func @cnn_kernel(%arg0: i32, %arg1: memref<64x40xf32, #tpu.memory_space<vmem>>, %arg2: memref<40x128xf32, #tpu.memory_space<vmem>>, %arg3: memref<1x128xf32, #tpu.memory_space<vmem>>, %arg4: memref<4x128xf32, #tpu.memory_space<vmem>>) attributes {dimension_semantics = [#tpu.dimension_semantics<parallel>], iteration_bounds = array<i64: 1>, scalar_prefetch = 0 : i64, scratch_operands = 0 : i64, tpu.core_type = #tpu.core_type<tc>, window_params = [{transform_indices = @transform_0, window_bounds = array<i64: 64, 40>}, {pipeline_mode = #tpu.pipeline_mode<synchronous>, transform_indices = @transform_1, window_bounds = array<i64: 40, 128>}, {pipeline_mode = #tpu.pipeline_mode<synchronous>, transform_indices = @transform_2, window_bounds = array<i64: 1, 128>}, {transform_indices = @transform_3, window_bounds = array<i64: 4, 128>}]} {
    %c0 = arith.constant 0 : index
    %c0_0 = arith.constant 0 : index
    %0 = vector.load %arg1[%c0, %c0_0] : memref<64x40xf32, #tpu.memory_space<vmem>>, vector<64x40xf32>
    %c0_1 = arith.constant 0 : index
    %c0_2 = arith.constant 0 : index
    %1 = vector.load %arg2[%c0_1, %c0_2] : memref<40x128xf32, #tpu.memory_space<vmem>>, vector<40x128xf32>
    %cst = arith.constant dense<0.000000e+00> : vector<64x128xf32>
    %2 = tpu.matmul %0, %1, %cst {dimension_numbers = #tpu.dot_dimension_numbers<[1], [0], [0], [1], [0, 0, 1, 1], [], []>} : vector<64x40xf32>, vector<40x128xf32>, vector<64x128xf32> -> vector<64x128xf32>
    %3 = vector.shape_cast %2 : vector<64x128xf32> to vector<4x16x128xf32>
    %4 = tpu.iota {dimensions = array<i32: 1>} : vector<4x16x128xi32>
    %c10_i32 = arith.constant 10 : i32
    %5 = vector.broadcast %c10_i32 : i32 to vector<4x16x128xi32>
    %6 = arith.cmpi slt, %4, %5 : vector<4x16x128xi32>
    %cst_3 = arith.constant 0xFF800000 : f32
    %7 = vector.broadcast %cst_3 : f32 to vector<4x16x128xf32>
    %8 = arith.select %6, %3, %7 : vector<4x16x128xi1>, vector<4x16x128xf32>
    %cst_4 = arith.constant dense<0xFF800000> : vector<4x128xf32>
    %9 = vector.multi_reduction <maximumf>, %8, %cst_4 [1] : vector<4x16x128xf32> to vector<4x128xf32>
    %c0_5 = arith.constant 0 : index
    %c0_6 = arith.constant 0 : index
    %10 = vector.load %arg3[%c0_5, %c0_6] : memref<1x128xf32, #tpu.memory_space<vmem>>, vector<1x128xf32>
    %11 = vector.broadcast %10 : vector<1x128xf32> to vector<4x128xf32>
    %12 = arith.addf %9, %11 : vector<4x128xf32>
    %cst_7 = arith.constant 0.000000e+00 : f32
    %13 = vector.broadcast %cst_7 : f32 to vector<4x128xf32>
    %14 = arith.maximumf %12, %13 : vector<4x128xf32>
    %c0_8 = arith.constant 0 : index
    %c0_9 = arith.constant 0 : index
    %15 = vector.load %arg4[%c0_8, %c0_9] : memref<4x128xf32, #tpu.memory_space<vmem>>, vector<4x128xf32>
    tpu.vector_store %arg4[%c0_8, %c0_9], %14 {strides = array<i32>} : memref<4x128xf32, #tpu.memory_space<vmem>>, vector<4x128xf32>,
    return
  }
  func.func @transform_0(%arg0: i32) -> (i32, i32) {
    %c0_i32 = arith.constant 0 : i32
    %c0_i32_0 = arith.constant 0 : i32
    return %arg0, %c0_i32 : i32, i32
  }
  func.func @transform_1(%arg0: i32) -> (i32, i32) {
    %c0_i32 = arith.constant 0 : i32
    %c0_i32_0 = arith.constant 0 : i32
    %c0_i32_1 = arith.constant 0 : i32
    return %c0_i32, %c0_i32_0 : i32, i32
  }
  func.func @transform_2(%arg0: i32) -> (i32, i32) {
    %c0_i32 = arith.constant 0 : i32
    %c0_i32_0 = arith.constant 0 : i32
    %c0_i32_1 = arith.constant 0 : i32
    return %c0_i32, %c0_i32_0 : i32, i32
  }
  func.func @transform_3(%arg0: i32) -> (i32, i32) {
    %c0_i32 = arith.constant 0 : i32
    %c0_i32_0 = arith.constant 0 : i32
    return %arg0, %c0_i32 : i32, i32
  }
}

</mosaic_0001>

<bundles_post_ra>
// kernel: tpu_custom_call.1
= control target key start
LH: loop header
LB: loop body
LE: loop exit
PB: predicated region body
PF: predicated region fallthrough
CT: control target
= control target key end

     0   :  { %s307_s0 = inlined_call_operand.vmem [shape: f32[64,40], index: 0, kind: input, shape index: {}]   ;;  %s308_s1 = inlined_call_operand.vmem [shape: f32[40,128], index: 1, kind: input, shape index: {}]   ;;  %s309_s2 = inlined_call_operand.vmem [shape: f32[1,128], index: 2, kind: input, shape index: {}]   ;;  %s310_s3 = inlined_call_operand.hbm [shape: f32[4,128], index: 3, kind: output, shape index: {}]  }
   0x1   :  { %v27_v0 = vld [vmem:[%s308_s1 + $0x20] sm:$0xff]  ;;  %v26_v1 = vld [vmem:[%s308_s1 + $0x18] sm:$0xff]  ;;  %v25_v2 = vld [vmem:[%s308_s1 + $0x10] sm:$0xff] }
   0x2   :  { %64 = vmatpush.msra.mxu0 %v27_v0  ;;  %186 = vmatpush.msra.mxu1 %v27_v0  ;;  %v24_v3 = vld [vmem:[%s308_s1 + $0x8] sm:$0xff] }
   0x3   :  { %187 = vmatpush.msra.mxu2 %v27_v0  ;;  %188 = vmatpush.msra.mxu3 %v27_v0 }
   0x4   :  { %65 = vmatpush.msra.mxu0 %v26_v1  ;;  %189 = vmatpush.msra.mxu1 %v26_v1 }
   0x5   :  { %190 = vmatpush.msra.mxu2 %v26_v1  ;;  %191 = vmatpush.msra.mxu3 %v26_v1 }
   0x6   :  { %8 = vsyncpa [#allocation3], 0  ;;  %66 = vmatpush.msra.mxu0 %v25_v2  ;;  %192 = vmatpush.msra.mxu1 %v25_v2  ;;  %v23_v4 = vld [vmem:[%s308_s1] sm:$0xff]  ;;  %vm28_vm0 = vcmask 326656   ;;  %v17_v6 = vld [vmem:[%s307_s0 + $0x10] sm:$0xff]  ;;  %v94_v13 = vlaneseq  ;;  %vm152_vm2 = vcmask 1041409  }
   0x7   :  { %193 = vmatpush.msra.mxu2 %v25_v2  ;;  %194 = vmatpush.msra.mxu3 %v25_v2  ;;  %v15_v5 = vld [vmem:[%s307_s0] sm:$0xff]  ;;  %v21_v8 = vld [vmem:[%s307_s0 + $0x30] sm:$0xff]  ;;  %v16_v9 = vld [vmem:[%s307_s0 + $0x8] sm:$0xff]  ;;  %vm155_vm3 = vcmask 1042434   ;;  %s169_s14 = sshll.u32 %s310_s3, 4  ;;  %vm158_vm4 = vcmask 1043459   ;;  %s170_s14 = int_to_ptr.hbm [resolvable:$true] %s169_s14 }
   0x8   :  { %67 = vmatpush.msra.mxu0 %v24_v3  ;;  %195 = vmatpush.msra.mxu1 %v24_v3  ;;  %v19_v7 = vld [vmem:[%s307_s0 + $0x20] sm:$0xff]  ;;  %v18_v10 = vld [vmem:[%s307_s0 + $0x18] sm:$0xff]  ;;  %v20_v11 = vld [vmem:[%s307_s0 + $0x28] sm:$0xff]  ;;  %v95_v14 = vshrl.u32 %v94_v13, 7 }
   0x9   :  { %196 = vmatpush.msra.mxu2 %v24_v3  ;;  %197 = vmatpush.msra.mxu3 %v24_v3  ;;  %v22_v12 = vld [vmem:[%s307_s0 + $0x38] sm:$0xff]  ;;  %v202_v42 = vld [vmem:[%s309_s2] ss:$0 sm:$0xff]  ;;  %s229_s2 = smov [#allocation2]  }
   0xa   :  { %68 = vmatpush.msra.mxu0 %v23_v4  ;;  %198 = vmatpush.msra.mxu1 %v23_v4  ;;  %v96_v17 = vadd.s32 8, %v95_v14  ;;  %s167_s11 = sshll.u32 %s229_s2, 4  ;;  %s168_s11 = int_to_ptr.vmem [resolvable:$true] %s167_s11 }
   0xb   :  { %199 = vmatpush.msra.mxu2 %v23_v4  ;;  %200 = vmatpush.msra.mxu3 %v23_v4 }
   0xc   :  { %178 = vmatmul.msk.f32.vlgmr.msra.gmra.mxu0 %vm28_vm0, %v15_v5  ;;  %180 = vmatmul.msk.f32.vlgmr.msra.gmra.mxu1 %vm28_vm0, %v17_v6  ;;  %vm98_vm1 = vcmp.lt.s32.totalorder %v96_v17, 10 }
   0xd   :  { %182 = vmatmul.msk.f32.vlgmr.msra.gmra.mxu2 %vm28_vm0, %v19_v7  ;;  %184 = vmatmul.msk.f32.vlgmr.msra.gmra.mxu3 %vm28_vm0, %v21_v8 }
  0x14   :  { %179 = vmatmul.msk.f32.gmra.mxu0 %vm28_vm0, %v16_v9  ;;  %181 = vmatmul.msk.f32.gmra.mxu1 %vm28_vm0, %v18_v10 }
  0x15   :  { %183 = vmatmul.msk.f32.gmra.mxu2 %vm28_vm0, %v20_v11  ;;  %185 = vmatmul.msk.f32.gmra.mxu3 %vm28_vm0, %v22_v12 }
  0x89   :  { %v70_v15 = vpop.f32.mrf.mxu0  ;;  %v76_v16 = vpop.f32.mrf.mxu1 }
  0x90   :  { %v82_v18 = vpop.f32.mrf.mxu2  ;;  %v88_v19 = vpop.f32.mrf.mxu3 }
  0x91   :  { %v73_v20 = vpop.f32.mrf.mxu0  ;;  %v79_v21 = vpop.f32.mrf.mxu1 }
  0x92   :  { %v100_v22 = vsel %vm98_vm1, %v73_v20, -inf  ;;  %v102_v23 = vsel %vm98_vm1, %v79_v21, -inf }
  0x93   :  { %v107_v24 = vmax.f32 %v70_v15, %v100_v22  ;;  %v114_v25 = vmax.f32 %v76_v16, %v102_v23 }
  0x95   :  { %v108_v26 = vrot.slane %v107_v24, 4  ;;  %v115_v27 = vrot.slane %v114_v25, 4 }
  0x97   :  { %v109_v28 = vmax.f32 %v107_v24, %v108_v26  ;;  %v116_v29 = vmax.f32 %v114_v25, %v115_v27 }
  0x98   :  { %v85_v30 = vpop.f32.mrf.mxu2  ;;  %v91_v31 = vpop.f32.mrf.mxu3 }
  0x99   :  { %v110_v32 = vrot.slane %v109_v28, 2  ;;  %v117_v33 = vrot.slane %v116_v29, 2  ;;  %v104_v34 = vsel %vm98_vm1, %v85_v30, -inf  ;;  %v106_v35 = vsel %vm98_vm1, %v91_v31, -inf }
  0x9a   :  { %v121_v36 = vmax.f32 %v82_v18, %v104_v34  ;;  %v128_v37 = vmax.f32 %v88_v19, %v106_v35 }
  0x9b   :  { %v111_v38 = vmax.f32 %v109_v28, %v110_v32  ;;  %v118_v39 = vmax.f32 %v116_v29, %v117_v33 }
  0x9c   :  { %v122_v40 = vrot.slane %v121_v36, 4  ;;  %v129_v41 = vrot.slane %v128_v37, 4 }
  0x9d   :  { %v119_v43 = vrot.slane %v118_v39, 1  ;;  %v112_v46 = vrot.slane %v111_v38, 1 }
  0x9e   :  { %v123_v44 = vmax.f32 %v121_v36, %v122_v40  ;;  %v130_v45 = vmax.f32 %v128_v37, %v129_v41 }
  0x9f   :  { %v120_v47 = vmax.f32 %v118_v39, %v119_v43  ;;  %v113_v53 = vmax.f32 %v111_v38, %v112_v46 }
  0xa0   :  { %v124_v48 = vrot.slane %v123_v44, 2  ;;  %v131_v49 = vrot.slane %v130_v45, 2 }
  0xa1   :  { %v140_v50 = vadd.f32 %v202_v42, %v120_v47  ;;  %v139_v59 = vadd.f32 %v202_v42, %v113_v53 }
  0xa2   :  { %v125_v51 = vmax.f32 %v123_v44, %v124_v48  ;;  %v132_v52 = vmax.f32 %v130_v45, %v131_v49 }
  0xa3   :  { %v144_v56 = vmax.f32 %v140_v50, 0.0  ;;  %v143_v1 = vmax.f32 %v139_v59, 0.0 }
  0xa4   :  { %v126_v54 = vrot.slane %v125_v51, 1  ;;  %v133_v55 = vrot.slane %v132_v52, 1 }
  0xa5   :  { %v151_v62 = vrot.slane %v144_v56, 7 }
  0xa6   :  { %v127_v57 = vmax.f32 %v125_v51, %v126_v54  ;;  %v134_v58 = vmax.f32 %v132_v52, %v133_v55 }
  0xa7   :  { %v153_v4 = vsel %vm152_vm2, %v151_v62, %v143_v1 }
  0xa8   :  { %v141_v60 = vadd.f32 %v202_v42, %v127_v57  ;;  %v142_v61 = vadd.f32 %v202_v42, %v134_v58 }
  0xaa   :  { %v145_v63 = vmax.f32 %v141_v60, 0.0  ;;  %v146_v0 = vmax.f32 %v142_v61, 0.0 }
  0xac   :  { %v154_v2 = vrot.slane %v145_v63, 6  ;;  %v157_v3 = vrot.slane %v146_v0, 5 }
  0xae   :  { %v156_v5 = vsel %vm155_vm3, %v154_v2, %v153_v4 }
  0xaf   :  { %v159_v6 = vsel %vm158_vm4, %v157_v3, %v156_v5 }
  0xb0   :  { %161 = vst [vmem:[#allocation2] sm:$0xf] %v159_v6 }
  0xb1   :  { %172 = dma.vmem_to_hbm [thread:$0]  %s168_s11, 64, %s170_s14, [#allocation3]  }
  0xb2   :  { %227 = dma.done.wait [#allocation3], 64  }
  0xb3   :  { %228 = vsyncadd [#allocation3], 4294967232 }
  0xb4   :  { %177 = vsyncpa [#allocation3], 1 }

</bundles_post_ra>
